<compile_context>
chip_gen: v7x
topology: tpu7x:2x2x1
jax: 0.10.0
libtpu: 0.0.40
codegen_flags: <defaults>
</compile_context>

<pallas_src>
import jax
import jax.numpy as jnp
from jax.experimental import pallas as pl
from jax.experimental.pallas import tpu as pltpu


def _gating_kernel(x_ref, w_ref, o_ref):
    # x_ref: (bn, d), w_ref: (d, e), o_ref: (bn, e)
    o_ref[...] = jnp.dot(
        x_ref[...], w_ref[...], preferred_element_type=jnp.float32
    ).astype(o_ref.dtype)


def gating_forward(x, gate_weight, *, block_n=512, compute_dtype=jnp.bfloat16):
    """Pallas equivalent of Gating.forward.

    x:           (b, n, d)  or  (b, h, n, d)
    gate_weight: (h, d, e)
    returns:     (b, h, n, e)   (h == 1 for single-headed input, matching PyTorch)
    """
    single_headed = x.ndim == 3
    if single_headed:
        x = x[:, None, :, :]                      # b n d -> b 1 n d

    b, h, n, d = x.shape
    hw, dw, e = gate_weight.shape
    assert dw == d and hw == h, "head/dim mismatch between x and gate weight"

    out_dtype = x.dtype

    # Cast the bandwidth-dominating operands to bf16; accumulate in f32 on MXU.
    x_c = x.astype(compute_dtype)
    w_c = gate_weight.astype(compute_dtype)

    # Single-headed: collapse (b, n) into one long row axis (amortizes the
    # per-grid-step overhead and gives one large parallel axis).
    if h == 1:
        rows = b * n
        b_eff = 1
        x_c = x_c.reshape(1, 1, rows, d)
    else:
        rows = n
        b_eff = b

    # Choose the row tile; pad rows up to a multiple of it if needed.
    if rows <= block_n:
        bn = rows                                  # block == full dim: always legal
        rows_pad = rows
    else:
        bn = block_n                               # multiple of 256: MXU / sublane friendly
        rows_pad = ((rows + bn - 1) // bn) * bn
        if rows_pad != rows:
            x_c = jnp.pad(x_c, ((0, 0), (0, 0), (0, rows_pad - rows), (0, 0)))

    n_tiles = rows_pad // bn
    grid = (h, b_eff, n_tiles)                     # h outermost -> weight stays resident

    # Explicit VMEM budget: double-buffered x/out tiles + weight (+ headroom),
    # capped so it also fits v7x's 64 MiB VMEM per TensorCore.
    in_isz = jnp.dtype(compute_dtype).itemsize
    out_isz = jnp.dtype(out_dtype).itemsize
    need = 2 * (bn * d * in_isz + bn * e * out_isz + d * e * in_isz)
    vmem_limit = int(min(max(need + (2 << 20), 32 << 20), 64 << 20))

    out = pl.pallas_call(
        _gating_kernel,
        out_shape=jax.ShapeDtypeStruct((b_eff, h, rows_pad, e), out_dtype),
        grid_spec=pltpu.PrefetchScalarGridSpec(
            num_scalar_prefetch=0,
            grid=grid,
            in_specs=[
                # (bn, d) row tile of x for this (head, batch, row-tile)
                pl.BlockSpec(
                    (pl.Squeezed(), pl.Squeezed(), bn, d),
                    lambda hi, bi, ni: (bi, hi, ni, 0),
                ),
                # (d, e) weight slab: block index depends only on the head,
                # so it is not re-fetched across the inner b / row-tile steps.
                pl.BlockSpec(
                    (pl.Squeezed(), d, e),
                    lambda hi, bi, ni: (hi, 0, 0),
                ),
            ],
            out_specs=pl.BlockSpec(
                (pl.Squeezed(), pl.Squeezed(), bn, e),
                lambda hi, bi, ni: (bi, hi, ni, 0),
            ),
        ),
        compiler_params=pltpu.CompilerParams(
            dimension_semantics=("parallel", "parallel", "parallel"),
            vmem_limit_bytes=vmem_limit,
        ),
    )(x_c, w_c)

    out = out[:, :, :rows, :]
    if h == 1:
        out = out.reshape(b, n, e)[:, None, :, :]
    return out


def gating_reference(x, gate_weight, dtype=None):
    if x.ndim == 3:
        x = x[:, None, :, :]
    if dtype is not None:
        x = x.astype(dtype)
        gate_weight = gate_weight.astype(dtype)
    return jnp.einsum(
        "bhnd,hde->bhne", x, gate_weight, preferred_element_type=jnp.float32
    )


if __name__ == "__main__":
    key = jax.random.PRNGKey(0)
    k_x, k_w = jax.random.split(key)

    # Small shapes consistent with the module: batch=2, seq=8, hidden dim=32,
    # heads=1 (single-headed x of ndim==3), num_experts=8.
    b, n, dim, heads, num_experts = 2, 8, 32, 1, 8

    x = jax.random.normal(k_x, (b, n, dim), dtype=jnp.float32)
    # deterministic "torch.randn(heads, dim, num_experts)"-style init
    gate_weight = jax.random.normal(k_w, (heads, dim, num_experts), dtype=jnp.float32)

    gates = gating_forward(x, gate_weight)
    gates = jax.block_until_ready(gates)

    assert gates.shape == (b, heads, n, num_experts)

    # Apples-to-apples check: same bf16-cast inputs, f32 accumulation.
    ref_bf16 = gating_reference(x, gate_weight, dtype=jnp.bfloat16).astype(x.dtype)
    assert jnp.allclose(gates, ref_bf16, atol=1e-3, rtol=1e-3), "mismatch vs bf16 reference"

    # Loose sanity check against the full-f32 einsum (bf16 input rounding only).
    ref_f32 = gating_reference(x, gate_weight)
    assert jnp.allclose(gates, ref_f32, atol=5e-2, rtol=5e-2), "mismatch vs f32 reference"

    print("KERNEL_OK")
</pallas_src>

<mosaic_0001>
module attributes {stable_mosaic.version = 11 : i64} {
  func.func @_gating_kernel(%arg0: i32, %arg1: i32, %arg2: i32, %arg3: memref<1x1x16x32xbf16, #tpu.memory_space<vmem>>, %arg4: memref<1x32x8xbf16, #tpu.memory_space<vmem>>, %arg5: memref<1x1x16x8xf32, #tpu.memory_space<vmem>>) attributes {dimension_semantics = [#tpu.dimension_semantics<parallel>, #tpu.dimension_semantics<parallel>, #tpu.dimension_semantics<parallel>], iteration_bounds = array<i64: 1, 1, 1>, scalar_prefetch = 0 : i64, scratch_operands = 0 : i64, tpu.core_type = #tpu.core_type<tc>, window_params = [{transform_indices = @transform_0, window_bounds = array<i64: 1, 1, 16, 32>}, {transform_indices = @transform_1, window_bounds = array<i64: 1, 32, 8>}, {transform_indices = @transform_2, window_bounds = array<i64: 1, 1, 16, 8>}]} {
    %c0 = arith.constant 0 : index
    %c0_0 = arith.constant 0 : index
    %c0_1 = arith.constant 0 : index
    %c0_2 = arith.constant 0 : index
    %0 = vector.load %arg3[%c0, %c0_0, %c0_1, %c0_2] : memref<1x1x16x32xbf16, #tpu.memory_space<vmem>>, vector<1x1x16x32xbf16>
    %1 = vector.shape_cast %0 : vector<1x1x16x32xbf16> to vector<16x32xbf16>
    %c0_3 = arith.constant 0 : index
    %c0_4 = arith.constant 0 : index
    %c0_5 = arith.constant 0 : index
    %2 = vector.load %arg4[%c0_3, %c0_4, %c0_5] : memref<1x32x8xbf16, #tpu.memory_space<vmem>>, vector<1x32x8xbf16>
    %3 = vector.shape_cast %2 : vector<1x32x8xbf16> to vector<32x8xbf16>
    %cst = arith.constant dense<0.000000e+00> : vector<16x8xf32>
    %4 = tpu.matmul %1, %3, %cst {dimension_numbers = #tpu.dot_dimension_numbers<[1], [0], [0], [1], [0, 0, 1, 1], [], []>} : vector<16x32xbf16>, vector<32x8xbf16>, vector<16x8xf32> -> vector<16x8xf32>
    %c0_6 = arith.constant 0 : index
    %c0_7 = arith.constant 0 : index
    %c0_8 = arith.constant 0 : index
    %c0_9 = arith.constant 0 : index
    %5 = vector.load %arg5[%c0_6, %c0_7, %c0_8, %c0_9] : memref<1x1x16x8xf32, #tpu.memory_space<vmem>>, vector<1x1x16x8xf32>
    %6 = vector.shape_cast %5 : vector<1x1x16x8xf32> to vector<16x8xf32>
    %7 = vector.shape_cast %4 : vector<16x8xf32> to vector<1x1x16x8xf32>
    tpu.vector_store %arg5[%c0_6, %c0_7, %c0_8, %c0_9], %7 {strides = array<i32>} : memref<1x1x16x8xf32, #tpu.memory_space<vmem>>, vector<1x1x16x8xf32>,
    return
  }
  func.func @transform_0(%arg0: i32, %arg1: i32, %arg2: i32) -> (i32, i32, i32, i32) {
    %c0_i32 = arith.constant 0 : i32
    %c0_i32_0 = arith.constant 0 : i32
    return %arg1, %arg0, %arg2, %c0_i32 : i32, i32, i32, i32
  }
  func.func @transform_1(%arg0: i32, %arg1: i32, %arg2: i32) -> (i32, i32, i32) {
    %c0_i32 = arith.constant 0 : i32
    %c0_i32_0 = arith.constant 0 : i32
    %c0_i32_1 = arith.constant 0 : i32
    return %arg0, %c0_i32, %c0_i32_0 : i32, i32, i32
  }
  func.func @transform_2(%arg0: i32, %arg1: i32, %arg2: i32) -> (i32, i32, i32, i32) {
    %c0_i32 = arith.constant 0 : i32
    %c0_i32_0 = arith.constant 0 : i32
    return %arg1, %arg0, %arg2, %c0_i32 : i32, i32, i32, i32
  }
}

</mosaic_0001>

<bundles_post_ra>
// kernel: tpu_custom_call.1
= control target key start
LH: loop header
LB: loop body
LE: loop exit
PB: predicated region body
PF: predicated region fallthrough
CT: control target
= control target key end

     0   :  { %v107_v0 = vmov 0.0   ;;  %vm108_vm0 = vmmov 0   ;;  %vm35_vm1 = vcmask 261120   ;;  %vm80_vm2 = vcmask 64512   ;;  %s139_s1 = inlined_call_operand.vmem [shape: bf16[1,32,8], index: 1, kind: input, shape index: {}]   ;;  %s140_s0 = inlined_call_operand.vmem [shape: bf16[1,1,16,32], index: 0, kind: input, shape index: {}]   ;;  %s141_s2 = inlined_call_operand.vmem [shape: f32[1,1,16,8], index: 2, kind: output, shape index: {}]  }
   0x1   :  { %94 = vmatprep.subr.bf16.mxu0 %v107_v0  ;;  %v104_v1 = vld [vmem:[%s139_s1] sm:$0xff]   ;;  %98 = vmatprep.mubr.msk.bf16.mxu0 %vm108_vm0, %v107_v0  ;;  %v105_v2 = vld [vmem:[%s139_s1 + $0x8] sm:$0xff]  }
   0x2   :  { %95 = vmatpush3.bf16.msra.mxu0 %v104_v1  ;;  %v106_v3 = vld [vmem:[%s140_s0] sm:$0xff]  }
   0x3   :  { %96 = vmatprep.subr.bf16.mxu0 %v107_v0 }
   0x6   :  { %97 = vmatpush3.bf16.msra.mxu0 %v105_v2 }
   0x9   :  { %99 = vmatmul.mubr.msk.bf16.vlgmr.msra.gmra.mrb[0].mxu0 %vm35_vm1, %v106_v3 }
  0xdc   :  { %v73_v4 = vpop.f32.mrb[0].mxu0 }
  0xdd   :  { %81 = vst.msk [vmem:[%s141_s2] sm:$0xff] %vm80_vm2, %v73_v4  ;;  %v100_v5 = vpop.f32.mrb[1].mxu0 }
  0xde   :  { %v76_v6 = vpop.f32.mrb[2].mxu0 }
  0xdf   :  { %82 = vst.msk [vmem:[%s141_s2 + $0x8] sm:$0xff] %vm80_vm2, %v76_v6  ;;  %v101_v7 = vpop.f32.mrb[3].mxu0 }

</bundles_post_ra>
